<compile_context>
chip_gen: v5e
topology: v5e:2x2
jax: 0.10.0
libtpu: 0.0.40
codegen_flags: <defaults>
</compile_context>

<pallas_src>
import jax
import jax.numpy as jnp
from jax.experimental import pallas as pl
from jax.experimental.pallas import tpu as pltpu

IN_FEATURES = 32 * 32 * 3      # 3072
HIDDEN = 100
OUT = 10
HIDDEN_PAD = 128               # lane-aligned padding of the hidden dim
OUT_PAD = 128                  # lane-aligned padding of the logits inside the kernel
TB_MAX = 1024                  # batch tile (rows); bounded by explicit vmem limit
VMEM_LIMIT_BYTES = 40 << 20    # fits v5e/v6e (128 MiB) and v7x (64 MiB) physical VMEM


def _mlp_kernel(x_ref, w1_ref, b1_ref, w2_ref, b2_ref, o_ref):
    # x_ref:  [TB, 3072] f32      w1_ref: [3072, 128] bf16   b1_ref: [1, 128] f32
    # w2_ref: [128, 128]  bf16    b2_ref: [1, 128]    f32    o_ref:  [TB, 10] f32
    #
    # b2_ref already carries -1e30 in its padded columns (>= OUT), and the padded
    # rows/cols of w1/w2 are zero, so no explicit masking is needed here.

    # fc1: cast the f32 input tile to bf16 in-kernel (MXU-friendly, f32 accum).
    x_bf = x_ref[...].astype(jnp.bfloat16)
    h = jnp.dot(x_bf, w1_ref[...], preferred_element_type=jnp.float32)
    h = jax.nn.sigmoid(h + b1_ref[...])

    # fc3: bf16 inputs, f32 accumulation; bias add in f32.
    logits = jnp.dot(h.astype(jnp.bfloat16), w2_ref[...],
                     preferred_element_type=jnp.float32) + b2_ref[...]

    # Numerically stable log_softmax over the 128 (padded) columns; padded
    # columns hold -1e30 so they contribute ~0 to the sum and never win the max.
    m = jnp.max(logits, axis=1, keepdims=True)
    shifted = logits - m
    lse = jnp.log(jnp.sum(jnp.exp(shifted), axis=1, keepdims=True))

    # Store only the real OUT columns (masked 10-lane store; output bytes tiny).
    o_ref[...] = (shifted - lse)[:, :OUT]


def pad_params(w1, b1, w2, b2):
    """Pad / cast parameters once (outside the per-call forward path)."""
    w1_p = (jnp.zeros((IN_FEATURES, HIDDEN_PAD), jnp.bfloat16)
            .at[:, :HIDDEN].set(w1.astype(jnp.bfloat16)))
    b1_p = jnp.zeros((1, HIDDEN_PAD), jnp.float32).at[0, :HIDDEN].set(b1)
    w2_p = (jnp.zeros((HIDDEN_PAD, OUT_PAD), jnp.bfloat16)
            .at[:HIDDEN, :OUT].set(w2.astype(jnp.bfloat16)))
    # Bake the padded-column mask into the bias: cols >= OUT get -1e30.
    b2_p = jnp.full((1, OUT_PAD), -1e30, jnp.float32).at[0, :OUT].set(b2)
    return w1_p, b1_p, w2_p, b2_p


def _choose_tb(B: int) -> int:
    """Batch tile: full batch when tiny, otherwise >=2 tiles (v7x megacore),
    a multiple of 8 (sublane rule), capped at TB_MAX."""
    if B <= 16:
        return B
    tb = ((pl.cdiv(B, 2) + 7) // 8) * 8
    return min(TB_MAX, tb)


@jax.jit
def q1_forward(x_nchw, w1_p, b1_p, w2_p, b2_p):
    # Flatten exactly like torch: x.view(-1, 32*32*3) on an NCHW tensor
    # (contiguous row-major reshape -> no data movement).
    B = x_nchw.shape[0]
    x = x_nchw.reshape(B, IN_FEATURES)

    tb = _choose_tb(B)
    grid = (pl.cdiv(B, tb),)

    cost = pl.CostEstimate(
        flops=2 * B * IN_FEATURES * HIDDEN_PAD + 2 * B * HIDDEN_PAD * OUT_PAD,
        transcendentals=B * (HIDDEN_PAD + OUT_PAD),
        bytes_accessed=(B * IN_FEATURES * 4             # x (f32, streamed)
                        + IN_FEATURES * HIDDEN_PAD * 2  # w1 (bf16)
                        + HIDDEN_PAD * OUT_PAD * 2      # w2 (bf16)
                        + B * OUT * 4),                 # out (f32, 10 cols only)
    )

    out = pl.pallas_call(
        _mlp_kernel,
        out_shape=jax.ShapeDtypeStruct((B, OUT), jnp.float32),
        grid=grid,
        in_specs=[
            pl.BlockSpec((tb, IN_FEATURES), lambda i: (i, 0)),          # x: tiled
            pl.BlockSpec((IN_FEATURES, HIDDEN_PAD), lambda i: (0, 0)),  # w1: resident
            pl.BlockSpec((1, HIDDEN_PAD), lambda i: (0, 0)),            # b1: resident
            pl.BlockSpec((HIDDEN_PAD, OUT_PAD), lambda i: (0, 0)),      # w2: resident
            pl.BlockSpec((1, OUT_PAD), lambda i: (0, 0)),               # b2: resident
        ],
        out_specs=pl.BlockSpec((tb, OUT), lambda i: (i, 0)),
        compiler_params=pltpu.CompilerParams(
            dimension_semantics=("parallel",),    # independent batch tiles
            vmem_limit_bytes=VMEM_LIMIT_BYTES),
        cost_estimate=cost,
    )(x, w1_p, b1_p, w2_p, b2_p)

    return out  # [B, 10] log-probabilities


def _init_params(key):
    # Deterministic init mimicking nn.Linear default: U(-1/sqrt(fan_in), +1/sqrt(fan_in))
    k1, k2, k3, k4 = jax.random.split(key, 4)
    bound1 = 1.0 / jnp.sqrt(jnp.float32(IN_FEATURES))
    bound2 = 1.0 / jnp.sqrt(jnp.float32(HIDDEN))
    w1 = jax.random.uniform(k1, (IN_FEATURES, HIDDEN), jnp.float32, -bound1, bound1)
    b1 = jax.random.uniform(k2, (HIDDEN,), jnp.float32, -bound1, bound1)
    w2 = jax.random.uniform(k3, (HIDDEN, OUT), jnp.float32, -bound2, bound2)
    b2 = jax.random.uniform(k4, (OUT,), jnp.float32, -bound2, bound2)
    return w1, b1, w2, b2


def _reference(x_nchw, w1, b1, w2, b2):
    x = x_nchw.reshape(x_nchw.shape[0], IN_FEATURES)
    h = jax.nn.sigmoid(x @ w1 + b1)
    return jax.nn.log_softmax(h @ w2 + b2, axis=1)


if __name__ == "__main__":
    key = jax.random.PRNGKey(0)
    k_x, k_p = jax.random.split(key)

    # Small example input consistent with the module: NCHW [2, 3, 32, 32]
    x = jax.random.normal(k_x, (2, 3, 32, 32), jnp.float32)
    w1, b1, w2, b2 = _init_params(k_p)

    # Pad / cast weights once (hoisted out of the forward path).
    w1_p, b1_p, w2_p, b2_p = jax.block_until_ready(pad_params(w1, b1, w2, b2))

    out = q1_forward(x, w1_p, b1_p, w2_p, b2_p)
    jax.block_until_ready(out)

    # Sanity checks: shape, log_softmax property, and loose match vs f32 reference
    # (bf16 matmul inputs -> small numeric differences expected).
    assert out.shape == (2, 10), out.shape
    row_sums = jnp.sum(jnp.exp(out), axis=1)
    assert jnp.allclose(row_sums, 1.0, atol=1e-4), row_sums
    ref = _reference(x, w1, b1, w2, b2)
    assert jnp.allclose(out, ref, atol=1e-1), jnp.max(jnp.abs(out - ref))

    print("KERNEL_OK")
</pallas_src>

<mosaic_0001>
module attributes {stable_mosaic.version = 11 : i64} {
  func.func @_mlp_kernel(%arg0: i32, %arg1: memref<2x3072xf32, #tpu.memory_space<vmem>>, %arg2: memref<3072x128xbf16, #tpu.memory_space<vmem>>, %arg3: memref<1x128xf32, #tpu.memory_space<vmem>>, %arg4: memref<128x128xbf16, #tpu.memory_space<vmem>>, %arg5: memref<1x128xf32, #tpu.memory_space<vmem>>, %arg6: memref<2x10xf32, #tpu.memory_space<vmem>>) attributes {dimension_semantics = [#tpu.dimension_semantics<parallel>], iteration_bounds = array<i64: 1>, scalar_prefetch = 0 : i64, scratch_operands = 0 : i64, tpu.core_type = #tpu.core_type<tc>, window_params = [{transform_indices = @transform_0, window_bounds = array<i64: 2, 3072>}, {pipeline_mode = #tpu.pipeline_mode<synchronous>, transform_indices = @transform_1, window_bounds = array<i64: 3072, 128>}, {pipeline_mode = #tpu.pipeline_mode<synchronous>, transform_indices = @transform_2, window_bounds = array<i64: 1, 128>}, {pipeline_mode = #tpu.pipeline_mode<synchronous>, transform_indices = @transform_3, window_bounds = array<i64: 128, 128>}, {pipeline_mode = #tpu.pipeline_mode<synchronous>, transform_indices = @transform_4, window_bounds = array<i64: 1, 128>}, {transform_indices = @transform_5, window_bounds = array<i64: 2, 10>}]} {
    %c0 = arith.constant 0 : index
    %c0_0 = arith.constant 0 : index
    %0 = vector.load %arg1[%c0, %c0_0] : memref<2x3072xf32, #tpu.memory_space<vmem>>, vector<2x3072xf32>
    %1 = arith.truncf %0 : vector<2x3072xf32> to vector<2x3072xbf16>
    %c0_1 = arith.constant 0 : index
    %c0_2 = arith.constant 0 : index
    %2 = vector.load %arg2[%c0_1, %c0_2] : memref<3072x128xbf16, #tpu.memory_space<vmem>>, vector<3072x128xbf16>
    %cst = arith.constant dense<0.000000e+00> : vector<2x128xf32>
    %3 = tpu.matmul %1, %2, %cst {dimension_numbers = #tpu.dot_dimension_numbers<[1], [0], [0], [1], [0, 0, 1, 1], [], []>} : vector<2x3072xbf16>, vector<3072x128xbf16>, vector<2x128xf32> -> vector<2x128xf32>
    %c0_3 = arith.constant 0 : index
    %c0_4 = arith.constant 0 : index
    %4 = vector.load %arg3[%c0_3, %c0_4] : memref<1x128xf32, #tpu.memory_space<vmem>>, vector<1x128xf32>
    %5 = vector.broadcast %4 : vector<1x128xf32> to vector<2x128xf32>
    %6 = arith.addf %3, %5 : vector<2x128xf32>
    %7 = arith.negf %6 : vector<2x128xf32>
    %8 = math.exp %7 : vector<2x128xf32>
    %cst_5 = arith.constant 1.000000e+00 : f32
    %9 = vector.broadcast %cst_5 : f32 to vector<2x128xf32>
    %10 = arith.addf %9, %8 : vector<2x128xf32>
    %11 = arith.divf %9, %10 : vector<2x128xf32>
    %12 = arith.truncf %11 : vector<2x128xf32> to vector<2x128xbf16>
    %c0_6 = arith.constant 0 : index
    %c0_7 = arith.constant 0 : index
    %13 = vector.load %arg4[%c0_6, %c0_7] : memref<128x128xbf16, #tpu.memory_space<vmem>>, vector<128x128xbf16>
    %cst_8 = arith.constant dense<0.000000e+00> : vector<2x128xf32>
    %14 = tpu.matmul %12, %13, %cst_8 {dimension_numbers = #tpu.dot_dimension_numbers<[1], [0], [0], [1], [0, 0, 1, 1], [], []>} : vector<2x128xbf16>, vector<128x128xbf16>, vector<2x128xf32> -> vector<2x128xf32>
    %c0_9 = arith.constant 0 : index
    %c0_10 = arith.constant 0 : index
    %15 = vector.load %arg5[%c0_9, %c0_10] : memref<1x128xf32, #tpu.memory_space<vmem>>, vector<1x128xf32>
    %16 = vector.broadcast %15 : vector<1x128xf32> to vector<2x128xf32>
    %17 = arith.addf %14, %16 : vector<2x128xf32>
    %cst_11 = arith.constant dense<0xFF800000> : vector<2xf32>
    %18 = vector.multi_reduction <maximumf>, %17, %cst_11 [1] : vector<2x128xf32> to vector<2xf32>
    %19 = vector.shape_cast %18 : vector<2xf32> to vector<2x1xf32>
    %20 = vector.broadcast %19 : vector<2x1xf32> to vector<2x128xf32>
    %21 = arith.subf %17, %20 : vector<2x128xf32>
    %22 = math.exp %21 : vector<2x128xf32>
    %cst_12 = arith.constant dense<0.000000e+00> : vector<2xf32>
    %23 = vector.multi_reduction <add>, %22, %cst_12 [1] : vector<2x128xf32> to vector<2xf32>
    %24 = vector.shape_cast %23 : vector<2xf32> to vector<2x1xf32>
    %25 = math.log %24 : vector<2x1xf32>
    %26 = vector.broadcast %25 : vector<2x1xf32> to vector<2x128xf32>
    %27 = arith.subf %21, %26 : vector<2x128xf32>
    %28 = vector.extract_strided_slice %27 {offsets = [0, 0], sizes = [2, 10], strides = [1, 1]} : vector<2x128xf32> to vector<2x10xf32>
    %c0_13 = arith.constant 0 : index
    %c0_14 = arith.constant 0 : index
    %29 = vector.load %arg6[%c0_13, %c0_14] : memref<2x10xf32, #tpu.memory_space<vmem>>, vector<2x10xf32>
    tpu.vector_store %arg6[%c0_13, %c0_14], %28 {strides = array<i32>} : memref<2x10xf32, #tpu.memory_space<vmem>>, vector<2x10xf32>,
    return
  }
  func.func @transform_0(%arg0: i32) -> (i32, i32) {
    %c0_i32 = arith.constant 0 : i32
    %c0_i32_0 = arith.constant 0 : i32
    return %arg0, %c0_i32 : i32, i32
  }
  func.func @transform_1(%arg0: i32) -> (i32, i32) {
    %c0_i32 = arith.constant 0 : i32
    %c0_i32_0 = arith.constant 0 : i32
    %c0_i32_1 = arith.constant 0 : i32
    return %c0_i32, %c0_i32_0 : i32, i32
  }
  func.func @transform_2(%arg0: i32) -> (i32, i32) {
    %c0_i32 = arith.constant 0 : i32
    %c0_i32_0 = arith.constant 0 : i32
    %c0_i32_1 = arith.constant 0 : i32
    return %c0_i32, %c0_i32_0 : i32, i32
  }
  func.func @transform_3(%arg0: i32) -> (i32, i32) {
    %c0_i32 = arith.constant 0 : i32
    %c0_i32_0 = arith.constant 0 : i32
    %c0_i32_1 = arith.constant 0 : i32
    return %c0_i32, %c0_i32_0 : i32, i32
  }
  func.func @transform_4(%arg0: i32) -> (i32, i32) {
    %c0_i32 = arith.constant 0 : i32
    %c0_i32_0 = arith.constant 0 : i32
    %c0_i32_1 = arith.constant 0 : i32
    return %c0_i32, %c0_i32_0 : i32, i32
  }
  func.func @transform_5(%arg0: i32) -> (i32, i32) {
    %c0_i32 = arith.constant 0 : i32
    %c0_i32_0 = arith.constant 0 : i32
    return %arg0, %c0_i32 : i32, i32
  }
}

</mosaic_0001>

<bundles_post_ra>
// kernel: q1_forward.1
= control target key start
LH: loop header
LB: loop body
LE: loop exit
PB: predicated region body
PF: predicated region fallthrough
CT: control target
= control target key end

     0   :  { %10 = vsyncpa [#allocation3], 0  ;;  %s3316_s0 = inlined_call_operand.vmem [shape: f32[2,3072], index: 0, kind: input, shape index: {}]   ;;  %s3317_s1 = inlined_call_operand.hbm [shape: bf16[3072,128], index: 1, kind: input, shape index: {}]   ;;  %s3318_s2 = inlined_call_operand.vmem [shape: f32[1,128], index: 2, kind: input, shape index: {}]   ;;  %s3319_s3 = inlined_call_operand.vmem [shape: bf16[128,128], index: 3, kind: input, shape index: {}]   ;;  %s3320_s4 = inlined_call_operand.vmem [shape: f32[1,128], index: 4, kind: input, shape index: {}]   ;;  %s3321_s5 = inlined_call_operand.hbm [shape: f32[2,10], index: 5, kind: output, shape index: {}]  }
   0x1   :  { %11 = vsyncpa [#allocation4], 0  ;;  %s18_s20 = sshll.u32 %s3317_s1, 4  ;;  %s3180_s21 = smov [#allocation2]   ;;  %s19_s20 = int_to_ptr.hbm [resolvable:$true] %s18_s20 }
   0x2   :  { %s20_s22 = sshll.u32 %s3180_s21, 4  ;;  %s3181_s23 = smov 64   ;;  %s21_s22 = int_to_ptr.vmem [resolvable:$true] %s20_s22 }
   0x3   :  { %s3182_s24 = smov 4  }
   0x4   :  { %26 = dma.hbm_to_vmem [thread:$0]  %s19_s20, 24576, %s21_s22, [#allocation3], %s3181_s23, %s3181_s23, %s3182_s24  }
   0x5   :  { %3176 = dma.done.wait [#allocation3], 24576  }
   0x6   :  { %3177 = vsyncadd [#allocation3], 4294942720  ;;  %v2921_v0 = vld [vmem:[#allocation2 + $0x38] sm:$0xff]  ;;  %v2920_v4 = vld [vmem:[#allocation2 + $0x30] sm:$0xff]  ;;  %vm2081_vm4 = vcmask 1041408   ;;  %s3183_s27 = smov [#allocation5]  }
   0x7   :  { %v2929_v1 = vld [vmem:[#allocation2 + $0x78] sm:$0xff]  ;;  %1668 = vmatpush.bf16.msra.mxu0 %v2921_v0  ;;  %v2928_v5 = vld [vmem:[#allocation2 + $0x70] sm:$0xff]  ;;  %v2919_v8 = vld [vmem:[#allocation2 + $0x28] sm:$0xff]  ;;  %s2101_s28 = sshll.u32 %s3183_s27, 4  ;;  %s2103_s30 = sshll.u32 %s3321_s5, 4  ;;  %vm2094_vm5 = vcmask 74752   ;;  %s2102_s28 = int_to_ptr.vmem [resolvable:$true] %s2101_s28  ;;  %s2104_s30 = int_to_ptr.hbm [resolvable:$true] %s2103_s30 }
   0x8   :  { %v2937_v2 = vld [vmem:[#allocation2 + $0xb8] sm:$0xff]  ;;  %1681 = vmatpush.bf16.msra.mxu1 %v2929_v1  ;;  %v2936_v6 = vld [vmem:[#allocation2 + $0xb0] sm:$0xff]  ;;  %v2927_v9 = vld [vmem:[#allocation2 + $0x68] sm:$0xff] }
   0x9   :  { %v2945_v3 = vld [vmem:[#allocation2 + $0xf8] sm:$0xff]  ;;  %1694 = vmatpush.bf16.msra.mxu2 %v2937_v2  ;;  %v2944_v7 = vld [vmem:[#allocation2 + $0xf0] sm:$0xff]  ;;  %v2935_v10 = vld [vmem:[#allocation2 + $0xa8] sm:$0xff] }
   0xa   :  { %1707 = vmatpush.bf16.msra.mxu3 %v2945_v3  ;;  %v2943_v11 = vld [vmem:[#allocation2 + $0xe8] sm:$0xff]  ;;  %v2918_v12 = vld [vmem:[#allocation2 + $0x20] sm:$0xff]  ;;  %v2917_v16 = vld [vmem:[#allocation2 + $0x18] sm:$0xff] }
   0xb   :  { %1669 = vmatpush.bf16.msra.mxu0 %v2920_v4  ;;  %v2926_v13 = vld [vmem:[#allocation2 + $0x60] sm:$0xff]  ;;  %v2925_v17 = vld [vmem:[#allocation2 + $0x58] sm:$0xff]  ;;  %v2916_v20 = vld [vmem:[#allocation2 + $0x10] sm:$0xff] }
   0xc   :  { %1682 = vmatpush.bf16.msra.mxu1 %v2928_v5  ;;  %v2934_v14 = vld [vmem:[#allocation2 + $0xa0] sm:$0xff]  ;;  %v2933_v18 = vld [vmem:[#allocation2 + $0x98] sm:$0xff]  ;;  %v2924_v21 = vld [vmem:[#allocation2 + $0x50] sm:$0xff] }
   0xd   :  { %1695 = vmatpush.bf16.msra.mxu2 %v2936_v6  ;;  %v2942_v15 = vld [vmem:[#allocation2 + $0xe0] sm:$0xff]  ;;  %v2941_v19 = vld [vmem:[#allocation2 + $0xd8] sm:$0xff]  ;;  %v2932_v23 = vld [vmem:[#allocation2 + $0x90] sm:$0xff] }
   0xe   :  { %1708 = vmatpush.bf16.msra.mxu3 %v2944_v7  ;;  %v37_v22 = vld [vmem:[%s3316_s0] sm:$0xff]  ;;  %v2940_v24 = vld [vmem:[#allocation2 + $0xd0] sm:$0xff]  ;;  %v2915_v25 = vld [vmem:[#allocation2 + $0x8] sm:$0xff] }
   0xf   :  { %1670 = vmatpush.bf16.msra.mxu0 %v2919_v8  ;;  %49 = vst [vmem:[#allocation1] ss:$4 sm:$0xff] %v37_v22  ;;  %v2923_v26 = vld [vmem:[#allocation2 + $0x48] sm:$0xff]  ;;  %v2914_v29 = vld [vmem:[#allocation2] sm:$0xff]  ;;  %v2953_v38 = vld [vmem:[#allocation2 + $0x138] sm:$0xff] }
  0x10   :  { %1683 = vmatpush.bf16.msra.mxu1 %v2927_v9  ;;  %v2931_v27 = vld [vmem:[#allocation2 + $0x88] sm:$0xff]  ;;  %v2922_v30 = vld [vmem:[#allocation2 + $0x40] sm:$0xff]  ;;  %v2961_v39 = vld [vmem:[#allocation2 + $0x178] sm:$0xff] }
  0x11   :  { %1696 = vmatpush.bf16.msra.mxu2 %v2935_v10  ;;  %v2939_v28 = vld [vmem:[#allocation2 + $0xc8] sm:$0xff]  ;;  %v2930_v31 = vld [vmem:[#allocation2 + $0x80] sm:$0xff]  ;;  %v2969_v40 = vld [vmem:[#allocation2 + $0x1b8] sm:$0xff] }
  0x12   :  { %1709 = vmatpush.bf16.msra.mxu3 %v2943_v11  ;;  %v2938_v33 = vld [vmem:[#allocation2 + $0xc0] sm:$0xff]  ;;  %v39_v35 = vld [vmem:[%s3316_s0 + $0x10] sm:$0xff]  ;;  %v2977_v41 = vld [vmem:[#allocation2 + $0x1f8] sm:$0xff] }
  0x13   :  { %1671 = vmatpush.bf16.msra.mxu0 %v2918_v12  ;;  %v38_v42 = vld [vmem:[%s3316_s0 + $0x8] sm:$0xff]  ;;  %v2952_v47 = vld [vmem:[#allocation2 + $0x130] sm:$0xff]  ;;  %v2951_v51 = vld [vmem:[#allocation2 + $0x128] sm:$0xff] }
  0x14   :  { %1684 = vmatpush.bf16.msra.mxu1 %v2926_v13  ;;  %51 = vst [vmem:[#allocation1 + $0x20] ss:$4 sm:$0xff] %v38_v42  ;;  %v2960_v48 = vld [vmem:[#allocation2 + $0x170] sm:$0xff]  ;;  %v2959_v52 = vld [vmem:[#allocation2 + $0x168] sm:$0xff]  ;;  %v2950_v55 = vld [vmem:[#allocation2 + $0x120] sm:$0xff] }
  0x15   :  { %1697 = vmatpush.bf16.msra.mxu2 %v2934_v14  ;;  %v2968_v49 = vld [vmem:[#allocation2 + $0x1b0] sm:$0xff]  ;;  %v2967_v53 = vld [vmem:[#allocation2 + $0x1a8] sm:$0xff]  ;;  %v2958_v57 = vld [vmem:[#allocation2 + $0x160] sm:$0xff] }
  0x16   :  { %1710 = vmatpush.bf16.msra.mxu3 %v2942_v15  ;;  %v54_v32 = vld.sshfl [vmem:[#allocation1 + $0x10] sm:$0xff pattern:$0x73625140]  ;;  %v52_v34 = vld.sshfl [vmem:[#allocation1] sm:$0xff pattern:$0x73625140] }
  0x17   :  { %1672 = vmatpush.bf16.msra.mxu0 %v2917_v16  ;;  %v55_v36 = vld.sshfl [vmem:[#allocation1 + $0x18] sm:$0xff pattern:$0x73625140]  ;;  %v53_v37 = vld.sshfl [vmem:[#allocation1 + $0x8] sm:$0xff pattern:$0x73625140]  ;;  %v106_v43 = vpack.c.bf16 %v54_v32, %v54_v32  ;;  %v104_v44 = vpack.c.bf16 %v52_v34, %v52_v34 }
  0x18   :  { %1685 = vmatpush.bf16.msra.mxu1 %v2925_v17  ;;  %60 = vst [vmem:[#allocation1] ss:$4 sm:$0xff] %v39_v35  ;;  %v107_v45 = vpack.c.bf16 %v55_v36, %v55_v36  ;;  %v105_v46 = vpack.c.bf16 %v53_v37, %v53_v37  ;;  %v2976_v50 = vld [vmem:[#allocation2 + $0x1f0] sm:$0xff]  ;;  %v2975_v54 = vld [vmem:[#allocation2 + $0x1e8] sm:$0xff]  ;;  %v2966_v62 = vld [vmem:[#allocation2 + $0x1a0] sm:$0xff] }
  0x19   :  { %1698 = vmatpush.bf16.msra.mxu2 %v2933_v18  ;;  %v40_v59 = vld [vmem:[%s3316_s0 + $0x18] sm:$0xff]  ;;  %v2974_v63 = vld [vmem:[#allocation2 + $0x1e0] sm:$0xff]  ;;  %v2949_v0 = vld [vmem:[#allocation2 + $0x118] sm:$0xff] }
  0x1a   :  { %1711 = vmatpush.bf16.msra.mxu3 %v2941_v19  ;;  %v2957_v1 = vld [vmem:[#allocation2 + $0x158] sm:$0xff]  ;;  %v2948_v4 = vld [vmem:[#allocation2 + $0x110] sm:$0xff]  ;;  %v2947_v8 = vld [vmem:[#allocation2 + $0x108] sm:$0xff] }
  0x1b   :  { %1673 = vmatpush.bf16.msra.mxu0 %v2916_v20  ;;  %v3226_v56 = vld.sshfl [vmem:[#allocation1 + $0x30] sm:$0xff pattern:$0x73625140]  ;;  %v3228_v58 = vld.sshfl [vmem:[#allocation1 + $0x20] sm:$0xff pattern:$0x73625140] }
  0x1c   :  { %1686 = vmatpush.bf16.msra.mxu1 %v2924_v21  ;;  %v3233_v60 = vld.sshfl [vmem:[#allocation1 + $0x38] sm:$0xff pattern:$0x73625140]  ;;  %v3235_v61 = vld.sshfl [vmem:[#allocation1 + $0x28] sm:$0xff pattern:$0x73625140]  ;;  %v110_v21 = vpack.c.bf16 %v3226_v56, %v3226_v56  ;;  %v108_v22 = vpack.c.bf16 %v3228_v58, %v3228_v58 }
  0x1d   :  { %1699 = vmatpush.bf16.msra.mxu2 %v2932_v23  ;;  %61 = vst [vmem:[#allocation1 + $0x20] ss:$4 sm:$0xff] %v40_v59  ;;  %v2965_v2 = vld [vmem:[#allocation2 + $0x198] sm:$0xff]  ;;  %v2956_v5 = vld [vmem:[#allocation2 + $0x150] sm:$0xff]  ;;  %v2955_v9 = vld [vmem:[#allocation2 + $0x148] sm:$0xff] }
  0x1e   :  { %1712 = vmatpush.bf16.msra.mxu3 %v2940_v24  ;;  %v2973_v3 = vld [vmem:[#allocation2 + $0x1d8] sm:$0xff]  ;;  %v2964_v6 = vld [vmem:[#allocation2 + $0x190] sm:$0xff]  ;;  %v2963_v10 = vld [vmem:[#allocation2 + $0x188] sm:$0xff] }
  0x1f   :  { %1674 = vmatpush.bf16.msra.mxu0 %v2915_v25  ;;  %v2972_v7 = vld [vmem:[#allocation2 + $0x1d0] sm:$0xff]  ;;  %v2971_v11 = vld [vmem:[#allocation2 + $0x1c8] sm:$0xff]  ;;  %v2946_v12 = vld [vmem:[#allocation2 + $0x100] sm:$0xff]  ;;  %v111_v25 = vpack.c.bf16 %v3233_v60, %v3233_v60 }
  0x20   :  { %1687 = vmatpush.bf16.msra.mxu1 %v2923_v26  ;;  %v2954_v13 = vld [vmem:[#allocation2 + $0x140] sm:$0xff]  ;;  %v2985_v16 = vld [vmem:[#allocation2 + $0x238] sm:$0xff]  ;;  %v2984_v20 = vld [vmem:[#allocation2 + $0x230] sm:$0xff]  ;;  %v109_v26 = vpack.c.bf16 %v3235_v61, %v3235_v61 }
  0x21   :  { %1700 = vmatpush.bf16.msra.mxu2 %v2931_v27  ;;  %v2962_v14 = vld [vmem:[#allocation2 + $0x180] sm:$0xff]  ;;  %v2993_v17 = vld [vmem:[#allocation2 + $0x278] sm:$0xff]  ;;  %v2992_v23 = vld [vmem:[#allocation2 + $0x270] sm:$0xff] }
  0x22   :  { %1713 = vmatpush.bf16.msra.mxu3 %v2939_v28  ;;  %v2970_v15 = vld [vmem:[#allocation2 + $0x1c0] sm:$0xff]  ;;  %v3001_v18 = vld [vmem:[#allocation2 + $0x2b8] sm:$0xff]  ;;  %v3000_v24 = vld [vmem:[#allocation2 + $0x2b0] sm:$0xff] }
  0x23   :  { %1675 = vmatpush.bf16.msra.mxu0 %v2914_v29  ;;  %v3009_v19 = vld [vmem:[#allocation2 + $0x2f8] sm:$0xff]  ;;  %v3247_v28 = vld.sshfl [vmem:[#allocation1 + $0x10] sm:$0xff pattern:$0x73625140]  ;;  %v2982_v37 = vld [vmem:[#allocation2 + $0x220] sm:$0xff] }
  0x24   :  { %1688 = vmatpush.bf16.msra.mxu1 %v2922_v30  ;;  %v3245_v27 = vld.sshfl [vmem:[#allocation1] sm:$0xff pattern:$0x73625140]  ;;  %v3249_v29 = vld.sshfl [vmem:[#allocation1 + $0x8] sm:$0xff pattern:$0x73625140] }
  0x25   :  { %1701 = vmatpush.bf16.msra.mxu2 %v2930_v31  ;;  %v3008_v30 = vld [vmem:[#allocation2 + $0x2f0] sm:$0xff]  ;;  %v41_v31 = vld [vmem:[%s3316_s0 + $0x20] sm:$0xff]  ;;  %v2991_v34 = vld [vmem:[#allocation2 + $0x268] sm:$0xff]  ;;  %v112_v61 = vpack.c.bf16 %v3245_v27, %v3245_v27 }
  0x26   :  { %1714 = vmatpush.bf16.msra.mxu3 %v2938_v33  ;;  %1676 = vmatmul.bf16.vlgmr.msra.gmra.mxu0 %v104_v44  ;;  %v3254_v32 = vld.sshfl [vmem:[#allocation1 + $0x18] sm:$0xff pattern:$0x73625140]  ;;  %v2983_v33 = vld [vmem:[#allocation2 + $0x228] sm:$0xff]  ;;  %v2989_v42 = vld [vmem:[#allocation2 + $0x258] sm:$0xff] }
  0x27   :  { %1720 = vmatpush.bf16.msrb.mxu0 %v2953_v38  ;;  %1689 = vmatmul.bf16.vlgmr.msra.gmra.mxu1 %v105_v46  ;;  %70 = vst [vmem:[#allocation1] ss:$4 sm:$0xff] %v41_v31  ;;  %v2999_v35 = vld [vmem:[#allocation2 + $0x2a8] sm:$0xff]  ;;  %v2990_v38 = vld [vmem:[#allocation2 + $0x260] sm:$0xff]  ;;  %v3005_v44 = vld [vmem:[#allocation2 + $0x2d8] sm:$0xff] }
  0x28   :  { %1733 = vmatpush.bf16.msrb.mxu1 %v2961_v39  ;;  %1702 = vmatmul.bf16.vlgmr.msra.gmra.mxu2 %v106_v43  ;;  %v3007_v36 = vld [vmem:[#allocation2 + $0x2e8] sm:$0xff]  ;;  %v2998_v39 = vld [vmem:[#allocation2 + $0x2a0] sm:$0xff]  ;;  %v2997_v43 = vld [vmem:[#allocation2 + $0x298] sm:$0xff] }
  0x29   :  { %1746 = vmatpush.bf16.msrb.mxu2 %v2969_v40  ;;  %1715 = vmatmul.bf16.vlgmr.msra.gmra.mxu3 %v107_v45  ;;  %v3006_v40 = vld [vmem:[#allocation2 + $0x2e0] sm:$0xff]  ;;  %v2980_v45 = vld [vmem:[#allocation2 + $0x210] sm:$0xff]  ;;  %v3025_v58 = vld [vmem:[#allocation2 + $0x378] sm:$0xff] }
  0x2a   :  { %1759 = vmatpush.bf16.msrb.mxu3 %v2977_v41  ;;  %v2981_v41 = vld [vmem:[#allocation2 + $0x218] sm:$0xff]  ;;  %v2988_v46 = vld [vmem:[#allocation2 + $0x250] sm:$0xff]  ;;  %v3002_v56 = vld [vmem:[#allocation2 + $0x2c0] sm:$0xff] }
  0x2b   :  { %1721 = vmatpush.bf16.msrb.mxu0 %v2952_v47  ;;  %v2996_v47 = vld [vmem:[#allocation2 + $0x290] sm:$0xff]  ;;  %v3033_v59 = vld [vmem:[#allocation2 + $0x3b8] sm:$0xff]  ;;  %v3019_v27 = vld [vmem:[#allocation2 + $0x348] sm:$0xff] }
  0x2c   :  { %1734 = vmatpush.bf16.msrb.mxu1 %v2960_v48  ;;  %v3004_v48 = vld [vmem:[#allocation2 + $0x2d0] sm:$0xff]  ;;  %v3041_v60 = vld [vmem:[#allocation2 + $0x3f8] sm:$0xff]  ;;  %v3018_v31 = vld [vmem:[#allocation2 + $0x340] sm:$0xff] }
  0x2d   :  { %1747 = vmatpush.bf16.msrb.mxu2 %v2968_v49  ;;  %v2979_v49 = vld [vmem:[#allocation2 + $0x208] sm:$0xff] }
  0x2e   :  { %1760 = vmatpush.bf16.msrb.mxu3 %v2976_v50  ;;  %v2987_v50 = vld [vmem:[#allocation2 + $0x248] sm:$0xff] }
  0x2f   :  { %1722 = vmatpush.bf16.msrb.mxu0 %v2951_v51  ;;  %v2995_v51 = vld [vmem:[#allocation2 + $0x288] sm:$0xff] }
  0x30   :  { %1735 = vmatpush.bf16.msrb.mxu1 %v2959_v52  ;;  %v3003_v52 = vld [vmem:[#allocation2 + $0x2c8] sm:$0xff] }
  0x31   :  { %1748 = vmatpush.bf16.msrb.mxu2 %v2967_v53  ;;  %v2978_v53 = vld [vmem:[#allocation2 + $0x200] sm:$0xff] }
  0x32   :  { %1761 = vmatpush.bf16.msrb.mxu3 %v2975_v54  ;;  %v2986_v54 = vld [vmem:[#allocation2 + $0x240] sm:$0xff] }
  0x33   :  { %1723 = vmatpush.bf16.msrb.mxu0 %v2950_v55  ;;  %v2994_v55 = vld [vmem:[#allocation2 + $0x280] sm:$0xff] }
  0x34   :  { %1736 = vmatpush.bf16.msrb.mxu1 %v2958_v57  ;;  %v3017_v57 = vld [vmem:[#allocation2 + $0x338] sm:$0xff] }
  0x35   :  { %1749 = vmatpush.bf16.msrb.mxu2 %v2966_v62  ;;  %v114_v62 = vpack.c.bf16 %v3247_v28, %v3247_v28  ;;  %v3027_v28 = vld [vmem:[#allocation2 + $0x388] sm:$0xff] }
  0x36   :  { %1762 = vmatpush.bf16.msrb.mxu3 %v2974_v63  ;;  %v3016_v63 = vld [vmem:[#allocation2 + $0x330] sm:$0xff] }
  0x37   :  { %1724 = vmatpush.bf16.msrb.mxu0 %v2949_v0  ;;  %v113_v0 = vpack.c.bf16 %v3249_v29, %v3249_v29  ;;  %v3035_v29 = vld [vmem:[#allocation2 + $0x3c8] sm:$0xff] }
  0x38   :  { %1737 = vmatpush.bf16.msrb.mxu1 %v2957_v1  ;;  %v115_v1 = vpack.c.bf16 %v3254_v32, %v3254_v32  ;;  %v3026_v32 = vld [vmem:[#allocation2 + $0x380] sm:$0xff] }
  0x39   :  { %1750 = vmatpush.bf16.msrb.mxu2 %v2965_v2  ;;  %v3024_v2 = vld [vmem:[#allocation2 + $0x370] sm:$0xff] }
  0x3a   :  { %1763 = vmatpush.bf16.msrb.mxu3 %v2973_v3  ;;  %v3032_v3 = vld [vmem:[#allocation2 + $0x3b0] sm:$0xff] }
  0x3b   :  { %1725 = vmatpush.bf16.msrb.mxu0 %v2948_v4  ;;  %v3264_v4 = vld.sshfl [vmem:[#allocation1 + $0x20] sm:$0xff pattern:$0x73625140] }
  0x3c   :  { %1738 = vmatpush.bf16.msrb.mxu1 %v2956_v5  ;;  %v3266_v5 = vld.sshfl [vmem:[#allocation1 + $0x30] sm:$0xff pattern:$0x73625140] }
  0x3d   :  { %1751 = vmatpush.bf16.msrb.mxu2 %v2964_v6  ;;  %v3268_v6 = vld.sshfl [vmem:[#allocation1 + $0x28] sm:$0xff pattern:$0x73625140] }
  0x3e   :  { %1764 = vmatpush.bf16.msrb.mxu3 %v2972_v7  ;;  %v3040_v7 = vld [vmem:[#allocation2 + $0x3f0] sm:$0xff] }
  0x3f   :  { %1726 = vmatpush.bf16.msrb.mxu0 %v2947_v8  ;;  %v42_v8 = vld [vmem:[%s3316_s0 + $0x28] sm:$0xff] }
  0x40   :  { %1739 = vmatpush.bf16.msrb.mxu1 %v2955_v9  ;;  %v3273_v9 = vld.sshfl [vmem:[#allocation1 + $0x38] sm:$0xff pattern:$0x73625140] }
  0x41   :  { %1752 = vmatpush.bf16.msrb.mxu2 %v2963_v10  ;;  %71 = vst [vmem:[#allocation1 + $0x20] ss:$4 sm:$0xff] %v42_v8  ;;  %v3015_v10 = vld [vmem:[#allocation2 + $0x328] sm:$0xff]  ;;  %v72_v8 = vld.sshfl [vmem:[#allocation1] sm:$0xff pattern:$0x73625140] }
  0x42   :  { %1765 = vmatpush.bf16.msrb.mxu3 %v2971_v11  ;;  %v3023_v11 = vld [vmem:[#allocation2 + $0x368] sm:$0xff] }
  0x43   :  { %1727 = vmatpush.bf16.msrb.mxu0 %v2946_v12  ;;  %v3031_v12 = vld [vmem:[#allocation2 + $0x3a8] sm:$0xff] }
  0x44   :  { %1740 = vmatpush.bf16.msrb.mxu1 %v2954_v13  ;;  %v3039_v13 = vld [vmem:[#allocation2 + $0x3e8] sm:$0xff] }
  0x45   :  { %1753 = vmatpush.bf16.msrb.mxu2 %v2962_v14  ;;  %v3014_v14 = vld [vmem:[#allocation2 + $0x320] sm:$0xff] }
  0x46   :  { %1766 = vmatpush.bf16.msrb.mxu3 %v2970_v15  ;;  %1728 = vmatmul.bf16.vlgmr.msrb.gmra.mxu0 %v108_v22  ;;  %v3022_v15 = vld [vmem:[#allocation2 + $0x360] sm:$0xff]  ;;  %v3012_v22 = vld [vmem:[#allocation2 + $0x310] sm:$0xff] }
  0x47   :  { %1772 = vmatpush.bf16.msra.mxu0 %v2985_v16  ;;  %1741 = vmatmul.bf16.vlgmr.msrb.gmra.mxu1 %v109_v26  ;;  %v3030_v16 = vld [vmem:[#allocation2 + $0x3a0] sm:$0xff]  ;;  %v3011_v26 = vld [vmem:[#allocation2 + $0x308] sm:$0xff] }
  0x48   :  { %1785 = vmatpush.bf16.msra.mxu1 %v2993_v17  ;;  %1754 = vmatmul.bf16.vlgmr.msrb.gmra.mxu2 %v110_v21  ;;  %v3038_v17 = vld [vmem:[#allocation2 + $0x3e0] sm:$0xff]  ;;  %v3037_v21 = vld [vmem:[#allocation2 + $0x3d8] sm:$0xff] }
  0x49   :  { %1798 = vmatpush.bf16.msra.mxu2 %v3001_v18  ;;  %1767 = vmatmul.bf16.vlgmr.msrb.gmra.mxu3 %v111_v25  ;;  %v3013_v18 = vld [vmem:[#allocation2 + $0x318] sm:$0xff]  ;;  %v3036_v25 = vld [vmem:[#allocation2 + $0x3d0] sm:$0xff] }
  0x4a   :  { %1811 = vmatpush.bf16.msra.mxu3 %v3009_v19  ;;  %v3021_v19 = vld [vmem:[#allocation2 + $0x358] sm:$0xff] }
  0x4b   :  { %1773 = vmatpush.bf16.msra.mxu0 %v2984_v20  ;;  %v3029_v20 = vld [vmem:[#allocation2 + $0x398] sm:$0xff] }
  0x4c   :  { %1786 = vmatpush.bf16.msra.mxu1 %v2992_v23  ;;  %v3020_v23 = vld [vmem:[#allocation2 + $0x350] sm:$0xff] }
  0x4d   :  { %1799 = vmatpush.bf16.msra.mxu2 %v3000_v24  ;;  %v3028_v24 = vld [vmem:[#allocation2 + $0x390] sm:$0xff] }
  0x4e   :  { %1812 = vmatpush.bf16.msra.mxu3 %v3008_v30  ;;  %v3010_v30 = vld [vmem:[#allocation2 + $0x300] sm:$0xff] }
  0x4f   :  { %1774 = vmatpush.bf16.msra.mxu0 %v2983_v33  ;;  %v3034_v33 = vld [vmem:[#allocation2 + $0x3c0] sm:$0xff] }
  0x50   :  { %1787 = vmatpush.bf16.msra.mxu1 %v2991_v34  ;;  %v3049_v34 = vld [vmem:[#allocation2 + $0x438] sm:$0xff] }
  0x51   :  { %1800 = vmatpush.bf16.msra.mxu2 %v2999_v35  ;;  %v3057_v35 = vld [vmem:[#allocation2 + $0x478] sm:$0xff] }
  0x52   :  { %1813 = vmatpush.bf16.msra.mxu3 %v3007_v36  ;;  %v3065_v36 = vld [vmem:[#allocation2 + $0x4b8] sm:$0xff] }
  0x53   :  { %1775 = vmatpush.bf16.msra.mxu0 %v2982_v37  ;;  %v3073_v37 = vld [vmem:[#allocation2 + $0x4f8] sm:$0xff] }
  0x54   :  { %1788 = vmatpush.bf16.msra.mxu1 %v2990_v38  ;;  %v116_v38 = vpack.c.bf16 %v3264_v4, %v3264_v4  ;;  %v3058_v4 = vld [vmem:[#allocation2 + $0x480] sm:$0xff] }
  0x55   :  { %1801 = vmatpush.bf16.msra.mxu2 %v2998_v39  ;;  %v118_v39 = vpack.c.bf16 %v3266_v5, %v3266_v5  ;;  %v3066_v5 = vld [vmem:[#allocation2 + $0x4c0] sm:$0xff] }
  0x56   :  { %1814 = vmatpush.bf16.msra.mxu3 %v3006_v40  ;;  %v117_v40 = vpack.c.bf16 %v3268_v6, %v3268_v6  ;;  %v3081_v6 = vld [vmem:[#allocation2 + $0x538] sm:$0xff] }
  0x57   :  { %1776 = vmatpush.bf16.msra.mxu0 %v2981_v41  ;;  %v119_v41 = vpack.c.bf16 %v3273_v9, %v3273_v9  ;;  %v74_v9 = vld.sshfl [vmem:[#allocation1 + $0x10] sm:$0xff pattern:$0x73625140] }
  0x58   :  { %1789 = vmatpush.bf16.msra.mxu1 %v2989_v42  ;;  %v3048_v42 = vld [vmem:[#allocation2 + $0x430] sm:$0xff] }
  0x59   :  { %1802 = vmatpush.bf16.msra.mxu2 %v2997_v43  ;;  %v3056_v43 = vld [vmem:[#allocation2 + $0x470] sm:$0xff] }
  0x5a   :  { %1815 = vmatpush.bf16.msra.mxu3 %v3005_v44  ;;  %v3064_v44 = vld [vmem:[#allocation2 + $0x4b0] sm:$0xff] }
  0x5b   :  { %1777 = vmatpush.bf16.msra.mxu0 %v2980_v45  ;;  %v3072_v45 = vld [vmem:[#allocation2 + $0x4f0] sm:$0xff] }
  0x5c   :  { %1790 = vmatpush.bf16.msra.mxu1 %v2988_v46  ;;  %v3047_v46 = vld [vmem:[#allocation2 + $0x428] sm:$0xff] }
  0x5d   :  { %1803 = vmatpush.bf16.msra.mxu2 %v2996_v47  ;;  %v3055_v47 = vld [vmem:[#allocation2 + $0x468] sm:$0xff] }
  0x5e   :  { %1816 = vmatpush.bf16.msra.mxu3 %v3004_v48  ;;  %v3063_v48 = vld [vmem:[#allocation2 + $0x4a8] sm:$0xff] }
  0x5f   :  { %1778 = vmatpush.bf16.msra.mxu0 %v2979_v49  ;;  %v3071_v49 = vld [vmem:[#allocation2 + $0x4e8] sm:$0xff] }
  0x60   :  { %1791 = vmatpush.bf16.msra.mxu1 %v2987_v50  ;;  %v3046_v50 = vld [vmem:[#allocation2 + $0x420] sm:$0xff] }
  0x61   :  { %1804 = vmatpush.bf16.msra.mxu2 %v2995_v51  ;;  %v3054_v51 = vld [vmem:[#allocation2 + $0x460] sm:$0xff] }
  0x62   :  { %1817 = vmatpush.bf16.msra.mxu3 %v3003_v52  ;;  %v3062_v52 = vld [vmem:[#allocation2 + $0x4a0] sm:$0xff] }
  0x63   :  { %1779 = vmatpush.bf16.msra.mxu0 %v2978_v53  ;;  %v3070_v53 = vld [vmem:[#allocation2 + $0x4e0] sm:$0xff] }
  0x64   :  { %1792 = vmatpush.bf16.msra.mxu1 %v2986_v54  ;;  %v3045_v54 = vld [vmem:[#allocation2 + $0x418] sm:$0xff] }
  0x65   :  { %1805 = vmatpush.bf16.msra.mxu2 %v2994_v55  ;;  %v3053_v55 = vld [vmem:[#allocation2 + $0x458] sm:$0xff] }
  0x66   :  { %1818 = vmatpush.bf16.msra.mxu3 %v3002_v56  ;;  %1780 = vmatmul.bf16.vlgmr.msra.gmra.mxu0 %v112_v61  ;;  %v3061_v56 = vld [vmem:[#allocation2 + $0x498] sm:$0xff]  ;;  %v3068_v61 = vld [vmem:[#allocation2 + $0x4d0] sm:$0xff] }
  0x67   :  { %1824 = vmatpush.bf16.msrb.mxu0 %v3017_v57  ;;  %1793 = vmatmul.bf16.vlgmr.msra.gmra.mxu1 %v113_v0  ;;  %v3069_v57 = vld [vmem:[#allocation2 + $0x4d8] sm:$0xff]  ;;  %v3059_v0 = vld [vmem:[#allocation2 + $0x488] sm:$0xff] }
  0x68   :  { %1837 = vmatpush.bf16.msrb.mxu1 %v3025_v58  ;;  %1806 = vmatmul.bf16.vlgmr.msra.gmra.mxu2 %v114_v62  ;;  %v3044_v58 = vld [vmem:[#allocation2 + $0x410] sm:$0xff]  ;;  %v3043_v62 = vld [vmem:[#allocation2 + $0x408] sm:$0xff] }
  0x69   :  { %1850 = vmatpush.bf16.msrb.mxu2 %v3033_v59  ;;  %1819 = vmatmul.bf16.vlgmr.msra.gmra.mxu3 %v115_v1  ;;  %v3052_v59 = vld [vmem:[#allocation2 + $0x450] sm:$0xff]  ;;  %v3067_v1 = vld [vmem:[#allocation2 + $0x4c8] sm:$0xff] }
  0x6a   :  { %1863 = vmatpush.bf16.msrb.mxu3 %v3041_v60  ;;  %v3060_v60 = vld [vmem:[#allocation2 + $0x490] sm:$0xff] }
  0x6b   :  { %1825 = vmatpush.bf16.msrb.mxu0 %v3016_v63  ;;  %v3051_v63 = vld [vmem:[#allocation2 + $0x448] sm:$0xff] }
  0x6c   :  { %1838 = vmatpush.bf16.msrb.mxu1 %v3024_v2  ;;  %v3042_v2 = vld [vmem:[#allocation2 + $0x400] sm:$0xff] }
  0x6d   :  { %1851 = vmatpush.bf16.msrb.mxu2 %v3032_v3  ;;  %v3050_v3 = vld [vmem:[#allocation2 + $0x440] sm:$0xff] }
  0x6e   :  { %1864 = vmatpush.bf16.msrb.mxu3 %v3040_v7  ;;  %v3089_v7 = vld [vmem:[#allocation2 + $0x578] sm:$0xff] }
  0x6f   :  { %1826 = vmatpush.bf16.msrb.mxu0 %v3015_v10  ;;  %v73_v10 = vld.sshfl [vmem:[#allocation1 + $0x8] sm:$0xff pattern:$0x73625140] }
  0x70   :  { %1839 = vmatpush.bf16.msrb.mxu1 %v3023_v11  ;;  %v75_v11 = vld.sshfl [vmem:[#allocation1 + $0x18] sm:$0xff pattern:$0x73625140] }
  0x71   :  { %1852 = vmatpush.bf16.msrb.mxu2 %v3031_v12  ;;  %v3097_v12 = vld [vmem:[#allocation2 + $0x5b8] sm:$0xff] }
  0x72   :  { %1865 = vmatpush.bf16.msrb.mxu3 %v3039_v13  ;;  %v3105_v13 = vld [vmem:[#allocation2 + $0x5f8] sm:$0xff] }
  0x73   :  { %1827 = vmatpush.bf16.msrb.mxu0 %v3014_v14  ;;  %v120_v14 = vpack.c.bf16 %v72_v8, %v72_v8 }
  0x74   :  { %1840 = vmatpush.bf16.msrb.mxu1 %v3022_v15  ;;  %v122_v15 = vpack.c.bf16 %v74_v9, %v74_v9 }
  0x75   :  { %1853 = vmatpush.bf16.msrb.mxu2 %v3030_v16  ;;  %v121_v16 = vpack.c.bf16 %v73_v10, %v73_v10 }
  0x76   :  { %1866 = vmatpush.bf16.msrb.mxu3 %v3038_v17  ;;  %v123_v17 = vpack.c.bf16 %v75_v11, %v75_v11 }
  0x77   :  { %1828 = vmatpush.bf16.msrb.mxu0 %v3013_v18  ;;  %v3080_v18 = vld [vmem:[#allocation2 + $0x530] sm:$0xff] }
  0x78   :  { %1841 = vmatpush.bf16.msrb.mxu1 %v3021_v19  ;;  %v3088_v19 = vld [vmem:[#allocation2 + $0x570] sm:$0xff] }
  0x79   :  { %1854 = vmatpush.bf16.msrb.mxu2 %v3029_v20  ;;  %v3096_v20 = vld [vmem:[#allocation2 + $0x5b0] sm:$0xff] }
  0x7a   :  { %1867 = vmatpush.bf16.msrb.mxu3 %v3037_v21  ;;  %v3104_v21 = vld [vmem:[#allocation2 + $0x5f0] sm:$0xff] }
  0x7b   :  { %1829 = vmatpush.bf16.msrb.mxu0 %v3012_v22  ;;  %v3079_v22 = vld [vmem:[#allocation2 + $0x528] sm:$0xff] }
  0x7c   :  { %1842 = vmatpush.bf16.msrb.mxu1 %v3020_v23  ;;  %v3087_v23 = vld [vmem:[#allocation2 + $0x568] sm:$0xff] }
  0x7d   :  { %1855 = vmatpush.bf16.msrb.mxu2 %v3028_v24  ;;  %v3118_v24 = vld [vmem:[%s3318_s2] ss:$0 sm:$0xff] }
  0x7e   :  { %1868 = vmatpush.bf16.msrb.mxu3 %v3036_v25  ;;  %v3095_v25 = vld [vmem:[#allocation2 + $0x5a8] sm:$0xff] }
  0x7f   :  { %1830 = vmatpush.bf16.msrb.mxu0 %v3011_v26  ;;  %v3103_v26 = vld [vmem:[#allocation2 + $0x5e8] sm:$0xff] }
  0x80   :  { %1843 = vmatpush.bf16.msrb.mxu1 %v3019_v27 }
  0x81   :  { %1856 = vmatpush.bf16.msrb.mxu2 %v3027_v28  ;;  %v3078_v28 = vld [vmem:[#allocation2 + $0x520] sm:$0xff] }
  0x82   :  { %1869 = vmatpush.bf16.msrb.mxu3 %v3035_v29  ;;  %v3086_v29 = vld [vmem:[#allocation2 + $0x560] sm:$0xff] }
  0x83   :  { %1831 = vmatpush.bf16.msrb.mxu0 %v3010_v30 }
  0x84   :  { %1844 = vmatpush.bf16.msrb.mxu1 %v3018_v31 }
  0x85   :  { %1857 = vmatpush.bf16.msrb.mxu2 %v3026_v32  ;;  %v3094_v32 = vld [vmem:[#allocation2 + $0x5a0] sm:$0xff] }
  0x86   :  { %1870 = vmatpush.bf16.msrb.mxu3 %v3034_v33  ;;  %1832 = vmatmul.bf16.vlgmr.msrb.gmra.mxu0 %v116_v38  ;;  %v3102_v33 = vld [vmem:[#allocation2 + $0x5e0] sm:$0xff]  ;;  %v3101_v38 = vld [vmem:[#allocation2 + $0x5d8] sm:$0xff] }
  0x87   :  { %1876 = vmatpush.bf16.msra.mxu0 %v3049_v34  ;;  %1845 = vmatmul.bf16.vlgmr.msrb.gmra.mxu1 %v117_v40 }
  0x88   :  { %1889 = vmatpush.bf16.msra.mxu1 %v3057_v35  ;;  %1858 = vmatmul.bf16.vlgmr.msrb.gmra.mxu2 %v118_v39  ;;  %v3077_v35 = vld [vmem:[#allocation2 + $0x518] sm:$0xff] }
  0x89   :  { %1902 = vmatpush.bf16.msra.mxu2 %v3065_v36  ;;  %1871 = vmatmul.bf16.vlgmr.msrb.gmra.mxu3 %v119_v41  ;;  %v3085_v36 = vld [vmem:[#allocation2 + $0x558] sm:$0xff] }
  0x8a   :  { %1915 = vmatpush.bf16.msra.mxu3 %v3073_v37  ;;  %v3093_v37 = vld [vmem:[#allocation2 + $0x598] sm:$0xff] }
  0x8b   :  { %1877 = vmatpush.bf16.msra.mxu0 %v3048_v42 }
  0x8c   :  { %1890 = vmatpush.bf16.msra.mxu1 %v3056_v43  ;;  %v3076_v43 = vld [vmem:[#allocation2 + $0x510] sm:$0xff] }
  0x8d   :  { %1903 = vmatpush.bf16.msra.mxu2 %v3064_v44  ;;  %v3084_v44 = vld [vmem:[#allocation2 + $0x550] sm:$0xff] }
  0x8e   :  { %1916 = vmatpush.bf16.msra.mxu3 %v3072_v45 }
  0x8f   :  { %1878 = vmatpush.bf16.msra.mxu0 %v3047_v46 }
  0x90   :  { %1891 = vmatpush.bf16.msra.mxu1 %v3055_v47  ;;  %v3092_v47 = vld [vmem:[#allocation2 + $0x590] sm:$0xff] }
  0x91   :  { %1904 = vmatpush.bf16.msra.mxu2 %v3063_v48  ;;  %v3100_v48 = vld [vmem:[#allocation2 + $0x5d0] sm:$0xff] }
  0x92   :  { %1917 = vmatpush.bf16.msra.mxu3 %v3071_v49  ;;  %v3075_v49 = vld [vmem:[#allocation2 + $0x508] sm:$0xff] }
  0x93   :  { %1879 = vmatpush.bf16.msra.mxu0 %v3046_v50  ;;  %v3083_v50 = vld [vmem:[#allocation2 + $0x548] sm:$0xff] }
  0x94   :  { %1892 = vmatpush.bf16.msra.mxu1 %v3054_v51  ;;  %v3091_v51 = vld [vmem:[#allocation2 + $0x588] sm:$0xff] }
  0x95   :  { %1905 = vmatpush.bf16.msra.mxu2 %v3062_v52  ;;  %v3099_v52 = vld [vmem:[#allocation2 + $0x5c8] sm:$0xff] }
  0x96   :  { %1918 = vmatpush.bf16.msra.mxu3 %v3070_v53 }
  0x97   :  { %1880 = vmatpush.bf16.msra.mxu0 %v3045_v54  ;;  %v3074_v54 = vld [vmem:[#allocation2 + $0x500] sm:$0xff] }
  0x98   :  { %1893 = vmatpush.bf16.msra.mxu1 %v3053_v55 }
  0x99   :  { %1906 = vmatpush.bf16.msra.mxu2 %v3061_v56  ;;  %v3082_v56 = vld [vmem:[#allocation2 + $0x540] sm:$0xff] }
  0x9a   :  { %1919 = vmatpush.bf16.msra.mxu3 %v3069_v57  ;;  %v3090_v57 = vld [vmem:[#allocation2 + $0x580] sm:$0xff] }
  0x9b   :  { %1881 = vmatpush.bf16.msra.mxu0 %v3044_v58  ;;  %v3098_v58 = vld [vmem:[#allocation2 + $0x5c0] sm:$0xff] }
  0x9c   :  { %1894 = vmatpush.bf16.msra.mxu1 %v3052_v59  ;;  %v76_v59 = vld.sshfl [vmem:[#allocation1 + $0x20] sm:$0xff pattern:$0x73625140] }
  0x9d   :  { %1907 = vmatpush.bf16.msra.mxu2 %v3060_v60  ;;  %v77_v60 = vld.sshfl [vmem:[#allocation1 + $0x28] sm:$0xff pattern:$0x73625140] }
  0x9e   :  { %1920 = vmatpush.bf16.msra.mxu3 %v3068_v61  ;;  %v78_v61 = vld.sshfl [vmem:[#allocation1 + $0x30] sm:$0xff pattern:$0x73625140] }
  0x9f   :  { %1882 = vmatpush.bf16.msra.mxu0 %v3043_v62  ;;  %v79_v62 = vld.sshfl [vmem:[#allocation1 + $0x38] sm:$0xff pattern:$0x73625140] }
  0xa0   :  { %1895 = vmatpush.bf16.msra.mxu1 %v3051_v63  ;;  %v124_v63 = vpack.c.bf16 %v76_v59, %v76_v59  ;;  %v3107_v59 = vld [vmem:[%s3319_s3 + $0x8] sm:$0xff] }
  0xa1   :  { %1908 = vmatpush.bf16.msra.mxu2 %v3059_v0  ;;  %v125_v0 = vpack.c.bf16 %v77_v60, %v77_v60 }
  0xa2   :  { %1921 = vmatpush.bf16.msra.mxu3 %v3067_v1  ;;  %v126_v1 = vpack.c.bf16 %v78_v61, %v78_v61  ;;  %v3106_v61 = vld [vmem:[%s3319_s3] sm:$0xff] }
  0xa3   :  { %1883 = vmatpush.bf16.msra.mxu0 %v3042_v2  ;;  %v1677_v27 = vpop.f32.mrf.mxu0  ;;  %v127_v2 = vpack.c.bf16 %v79_v62, %v79_v62 }
  0xa4   :  { %1896 = vmatpush.bf16.msra.mxu1 %v3050_v3  ;;  %v1678_v30 = vadd.f32 %v3118_v24, %v1677_v27  ;;  %v1690_v31 = vpop.f32.mrf.mxu1 }
  0xa5   :  { %1909 = vmatpush.bf16.msra.mxu2 %v3058_v4 }
  0xa6   :  { %1922 = vmatpush.bf16.msra.mxu3 %v3066_v5  ;;  %1884 = vmatmul.bf16.vlgmr.msra.gmra.mxu0 %v120_v14  ;;  %v1691_v34 = vadd.f32 %v1690_v31, %v1678_v30 }
  0xa7   :  { %1928 = vmatpush.bf16.msrb.mxu0 %v3081_v6  ;;  %1897 = vmatmul.bf16.vlgmr.msra.gmra.mxu1 %v121_v16 }
  0xa8   :  { %1941 = vmatpush.bf16.msrb.mxu1 %v3089_v7  ;;  %1910 = vmatmul.bf16.vlgmr.msra.gmra.mxu2 %v122_v15 }
  0xa9   :  { %1954 = vmatpush.bf16.msrb.mxu2 %v3097_v12  ;;  %1923 = vmatmul.bf16.vlgmr.msra.gmra.mxu3 %v123_v17 }
  0xaa   :  { %1967 = vmatpush.bf16.msrb.mxu3 %v3105_v13 }
  0xab   :  { %1929 = vmatpush.bf16.msrb.mxu0 %v3080_v18  ;;  %v1703_v39 = vpop.f32.mrf.mxu2  ;;  %v1679_v42 = vpop.f32.mrf.mxu0 }
  0xac   :  { %1942 = vmatpush.bf16.msrb.mxu1 %v3088_v19  ;;  %v1704_v40 = vadd.f32 %v1703_v39, %v1691_v34  ;;  %v1716_v41 = vpop.f32.mrf.mxu3  ;;  %v1692_v46 = vpop.f32.mrf.mxu1 }
  0xad   :  { %1955 = vmatpush.bf16.msrb.mxu2 %v3096_v20 }
  0xae   :  { %1968 = vmatpush.bf16.msrb.mxu3 %v3104_v21  ;;  %v1717_v45 = vadd.f32 %v1716_v41, %v1704_v40 }
  0xaf   :  { %1930 = vmatpush.bf16.msrb.mxu0 %v3079_v22 }
  0xb0   :  { %1943 = vmatpush.bf16.msrb.mxu1 %v3087_v23 }
  0xb1   :  { %1956 = vmatpush.bf16.msrb.mxu2 %v3095_v25 }
  0xb2   :  { %1969 = vmatpush.bf16.msrb.mxu3 %v3103_v26 }
  0xb3   :  { %1931 = vmatpush.bf16.msrb.mxu0 %v3078_v28  ;;  %v1705_v53 = vpop.f32.mrf.mxu2 }
  0xb4   :  { %1944 = vmatpush.bf16.msrb.mxu1 %v3086_v29  ;;  %v1718_v55 = vpop.f32.mrf.mxu3 }
  0xb5   :  { %1957 = vmatpush.bf16.msrb.mxu2 %v3094_v32  ;;  %v3108_v55 = vld [vmem:[%s3319_s3 + $0x10] sm:$0xff] }
  0xb6   :  { %1970 = vmatpush.bf16.msrb.mxu3 %v3102_v33 }
  0xb7   :  { %1932 = vmatpush.bf16.msrb.mxu0 %v3077_v35 }
  0xb8   :  { %1945 = vmatpush.bf16.msrb.mxu1 %v3085_v36 }
  0xb9   :  { %1958 = vmatpush.bf16.msrb.mxu2 %v3093_v37 }
  0xba   :  { %1971 = vmatpush.bf16.msrb.mxu3 %v3101_v38  ;;  %v3113_v38 = vld [vmem:[%s3319_s3 + $0x38] sm:$0xff] }
  0xbb   :  { %1933 = vmatpush.bf16.msrb.mxu0 %v3076_v43  ;;  %v3112_v43 = vld [vmem:[%s3319_s3 + $0x30] sm:$0xff] }
  0xbc   :  { %1946 = vmatpush.bf16.msrb.mxu1 %v3084_v44 }
  0xbd   :  { %1959 = vmatpush.bf16.msrb.mxu2 %v3092_v47  ;;  %v3111_v47 = vld [vmem:[%s3319_s3 + $0x28] sm:$0xff] }
  0xbe   :  { %1972 = vmatpush.bf16.msrb.mxu3 %v3100_v48 }
  0xbf   :  { %1934 = vmatpush.bf16.msrb.mxu0 %v3075_v49 }
  0xc0   :  { %1947 = vmatpush.bf16.msrb.mxu1 %v3083_v50  ;;  %v3110_v50 = vld [vmem:[%s3319_s3 + $0x20] sm:$0xff] }
  0xc1   :  { %1960 = vmatpush.bf16.msrb.mxu2 %v3091_v51 }
  0xc2   :  { %1973 = vmatpush.bf16.msrb.mxu3 %v3099_v52  ;;  %v3109_v52 = vld [vmem:[%s3319_s3 + $0x18] sm:$0xff] }
  0xc3   :  { %1935 = vmatpush.bf16.msrb.mxu0 %v3074_v54  ;;  %v1729_v3 = vpop.f32.mrf.mxu0 }
  0xc4   :  { %1948 = vmatpush.bf16.msrb.mxu1 %v3082_v56  ;;  %v1730_v4 = vadd.f32 %v1729_v3, %v1717_v45  ;;  %v1742_v5 = vpop.f32.mrf.mxu1 }
  0xc5   :  { %1961 = vmatpush.bf16.msrb.mxu2 %v3090_v57 }
  0xc6   :  { %1974 = vmatpush.bf16.msrb.mxu3 %v3098_v58  ;;  %1936 = vmatmul.bf16.vlgmr.msrb.gmra.mxu0 %v124_v63  ;;  %v1743_v6 = vadd.f32 %v1742_v5, %v1730_v4 }
  0xc7   :  { %1949 = vmatmul.bf16.vlgmr.msrb.gmra.mxu1 %v125_v0  ;;  %2068 = vmatpush.bf16.msra.mxu0 %v3113_v38 }
  0xc8   :  { %1962 = vmatmul.bf16.vlgmr.msrb.gmra.mxu2 %v126_v1 }
  0xc9   :  { %1975 = vmatmul.bf16.vlgmr.msrb.gmra.mxu3 %v127_v2 }
  0xcb   :  { %v1755_v7 = vpop.f32.mrf.mxu2  ;;  %v1731_v10 = vpop.f32.mrf.mxu0  ;;  %2069 = vmatpush.bf16.msra.mxu0 %v3112_v43 }
  0xcc   :  { %v1756_v8 = vadd.f32 %v1755_v7, %v1743_v6  ;;  %v1768_v9 = vpop.f32.mrf.mxu3  ;;  %v1744_v12 = vpop.f32.mrf.mxu1 }
  0xce   :  { %v1769_v11 = vadd.f32 %v1768_v9, %v1756_v8 }
  0xcf   :  { %2070 = vmatpush.bf16.msra.mxu0 %v3111_v47 }
  0xd3   :  { %v1757_v13 = vpop.f32.mrf.mxu2  ;;  %2071 = vmatpush.bf16.msra.mxu0 %v3110_v50 }
  0xd4   :  { %v1770_v14 = vpop.f32.mrf.mxu3 }
  0xd7   :  { %2072 = vmatpush.bf16.msra.mxu0 %v3109_v52 }
  0xdb   :  { %2073 = vmatpush.bf16.msra.mxu0 %v3108_v55 }
  0xdf   :  { %2074 = vmatpush.bf16.msra.mxu0 %v3107_v59 }
  0xe3   :  { %v1781_v15 = vpop.f32.mrf.mxu0  ;;  %2075 = vmatpush.bf16.msra.mxu0 %v3106_v61 }
  0xe4   :  { %v1782_v16 = vadd.f32 %v1781_v15, %v1769_v11  ;;  %v1794_v17 = vpop.f32.mrf.mxu1 }
  0xe6   :  { %v1795_v18 = vadd.f32 %v1794_v17, %v1782_v16 }
  0xeb   :  { %v1807_v19 = vpop.f32.mrf.mxu2  ;;  %v1783_v22 = vpop.f32.mrf.mxu0 }
  0xec   :  { %v1808_v20 = vadd.f32 %v1807_v19, %v1795_v18  ;;  %v1820_v21 = vpop.f32.mrf.mxu3  ;;  %v1796_v24 = vpop.f32.mrf.mxu1 }
  0xee   :  { %v1821_v23 = vadd.f32 %v1820_v21, %v1808_v20  ;;  %v3119_v21 = vld [vmem:[%s3320_s4] ss:$0 sm:$0xff] }
  0xf3   :  { %v1809_v25 = vpop.f32.mrf.mxu2 }
  0xf4   :  { %v1822_v26 = vpop.f32.mrf.mxu3 }
 0x103   :  { %v1833_v27 = vpop.f32.mrf.mxu0 }
 0x104   :  { %v1846_v28 = vpop.f32.mrf.mxu1  ;;  %v1834_v39 = vadd.f32 %v1833_v27, %v1821_v23 }
 0x106   :  { %v1847_v44 = vadd.f32 %v1846_v28, %v1834_v39 }
 0x10b   :  { %v1859_v29 = vpop.f32.mrf.mxu2  ;;  %v1835_v31 = vpop.f32.mrf.mxu0 }
 0x10c   :  { %v1872_v30 = vpop.f32.mrf.mxu3  ;;  %v1848_v32 = vpop.f32.mrf.mxu1  ;;  %v1860_v45 = vadd.f32 %v1859_v29, %v1847_v44 }
 0x10e   :  { %v1873_v49 = vadd.f32 %v1872_v30, %v1860_v45 }
 0x113   :  { %v1861_v33 = vpop.f32.mrf.mxu2 }
 0x114   :  { %v1874_v34 = vpop.f32.mrf.mxu3 }
 0x123   :  { %v1885_v35 = vpop.f32.mrf.mxu0 }
 0x124   :  { %v1898_v36 = vpop.f32.mrf.mxu1  ;;  %v1886_v51 = vadd.f32 %v1885_v35, %v1873_v49 }
 0x126   :  { %v1899_v53 = vadd.f32 %v1898_v36, %v1886_v51 }
 0x12b   :  { %v1911_v37 = vpop.f32.mrf.mxu2  ;;  %v1887_v41 = vpop.f32.mrf.mxu0 }
 0x12c   :  { %v1924_v40 = vpop.f32.mrf.mxu3  ;;  %v1900_v42 = vpop.f32.mrf.mxu1  ;;  %v1912_v54 = vadd.f32 %v1911_v37, %v1899_v53 }
 0x12e   :  { %v1925_v56 = vadd.f32 %v1924_v40, %v1912_v54 }
 0x133   :  { %v1913_v46 = vpop.f32.mrf.mxu2 }
 0x134   :  { %v1926_v48 = vpop.f32.mrf.mxu3 }
 0x143   :  { %v1937_v57 = vpop.f32.mrf.mxu0 }
 0x144   :  { %v1950_v58 = vpop.f32.mrf.mxu1  ;;  %v1938_v60 = vadd.f32 %v1937_v57, %v1925_v56 }
 0x146   :  { %v1951_v62 = vadd.f32 %v1950_v58, %v1938_v60 }
 0x14b   :  { %v1963_v63 = vpop.f32.mrf.mxu2  ;;  %v1939_v2 = vpop.f32.mrf.mxu0 }
 0x14c   :  { %v1976_v0 = vpop.f32.mrf.mxu3  ;;  %v1964_v1 = vadd.f32 %v1963_v63, %v1951_v62  ;;  %v1952_v3 = vpop.f32.mrf.mxu1 }
 0x14e   :  { %v1977_v4 = vadd.f32 %v1976_v0, %v1964_v1 }
 0x150   :  { %v2881_v5 = vmul.f32 -1.442695, %v1977_v4 }
 0x152   :  { %3120 = vpow2.f32 %v2881_v5 }
 0x153   :  { %v1965_v6 = vpop.f32.mrf.mxu2 }
 0x154   :  { %v1978_v7 = vpop.f32.mrf.mxu3 }
 0x158   :  { %v3121_v8 = vpop.eup %3120 }
 0x159   :  { %v1983_v9 = vadd.f32 1.0, %v3121_v8 }
 0x15b   :  { %3122 = vrcp.f32 %v1983_v9  ;;  %v1995_v13 = vand.u32 2147483648, %v1983_v9  ;;  %v1993_v15 = vand.u32 2147483647, %v1983_v9  ;;  %vm1989_vm1 = vweird.f32 %v1983_v9 }
 0x15d   :  { %v1996_v17 = vor.u32 1.1754944e-38, %v1995_v13  ;;  %vm1994_vm3 = vcmp.eq.f32.partialorder %v1993_v15, 8.507059e+37 }
 0x161   :  { %v3123_v10 = vpop.eup %3122 }
 0x162   :  { %v1985_v11 = vmul.f32 %v3123_v10, %v1983_v9  ;;  %vm1990_vm0 = vweird.f32 %v3123_v10 }
 0x163   :  { %vm1991_vm2 = vmor %vm1989_vm1, %vm1990_vm0 }
 0x164   :  { %v1986_v12 = vsub.f32 1.0, %v1985_v11 }
 0x166   :  { %v1987_v14 = vmul.f32 %v3123_v10, %v1986_v12 }
 0x168   :  { %v1988_v16 = vadd.f32 %v3123_v10, %v1987_v14 }
 0x16a   :  { %v1992_v18 = vsel %vm1991_vm2, %v3123_v10, %v1988_v16 }
 0x16b   :  { %v1997_v19 = vsel %vm1994_vm3, %v1996_v17, %v1992_v18 }
 0x16c   :  { %v1999_v20 = vpack.c.bf16 %v1997_v19, %v1997_v19 }
 0x16e   :  { %2076 = vmatmul.bf16.vlgmr.msra.gmra.mxu0 %v1999_v20 }
 0x1eb   :  { %v2077_v22 = vpop.f32.mrf.mxu0 }
 0x1ec   :  { %v2078_v23 = vadd.f32 %v3119_v21, %v2077_v22 }
 0x1ee   :  { %v2082_v24 = vsel %vm2081_vm4, %v2078_v23, -inf }
 0x1ef   :  { %2083 = vmax.xlane.f32.xlu0 %v2082_v24 }
 0x1f3   :  { %v2079_v25 = vpop.f32.mrf.mxu0 }
 0x262   :  { %v2084_v26 = vpop.xlane.xlu0 %2083 }
 0x263   :  { %v2085_v27 = vsub.f32 %v2078_v23, %v2084_v26 }
 0x265   :  { %v2086_v28 = vmul.f32 1.442695, %v2085_v27 }
 0x267   :  { %3124 = vpow2.f32 %v2086_v28 }
 0x26d   :  { %v3125_v29 = vpop.eup %3124 }
 0x26e   :  { %v2088_v30 = vsel %vm2081_vm4, %v3125_v29, 0.0 }
 0x26f   :  { %2089 = vadd.xlane.f32.xlu0 %v2088_v30 }
 0x2e2   :  { %v2090_v31 = vpop.xlane.xlu0 %2089 }
 0x2e3   :  { %3126 = vlog2.f32 %v2090_v31 }
 0x2e9   :  { %v3127_v32 = vpop.eup %3126 }
 0x2ea   :  { %v2092_v33 = vmul.f32 0.6931472, %v3127_v32 }
 0x2ec   :  { %v2093_v34 = vsub.f32 %v2085_v27, %v2092_v33 }
 0x2ee   :  { %2095 = vst.msk [vmem:[#allocation5] sm:$0x3] %vm2094_vm5, %v2093_v34 }
 0x2ef   :  { %2106 = dma.vmem_to_hbm [thread:$0]  %s2102_s28, 32, %s2104_s30, [#allocation4]  }
 0x2f0   :  { %3178 = dma.done.wait [#allocation4], 32  }
 0x2f1   :  { %3179 = vsyncadd [#allocation4], 4294967264 }
 0x2f2   :  { %2111 = vsyncpa [#allocation3], 1 }
 0x2f3   :  { %2112 = vsyncpa [#allocation4], 1 }

</bundles_post_ra>
